<compile_context>
chip_gen: v7x
topology: tpu7x:2x2x1
jax: 0.10.0
libtpu: 0.0.40
codegen_flags: <defaults>
</compile_context>

<pallas_src>
import math

import jax
import jax.numpy as jnp
from jax import lax
from jax.experimental import pallas as pl
from jax.experimental.pallas import tpu as pltpu


def _round_up(x, m):
    return ((x + m - 1) // m) * m


def _pponn_kernel(x_ref, w1_ref, b1_ref, w2_ref, b2_ref, w3_ref, b3_ref, o_ref):
    """One batch tile of the fused MLP, computed with batch on the lane axis.

    x_ref : (TB, n_in)   input rows (cast to bf16 in-kernel for the MXU)
    w1_ref: (H1, n_in)   bf16, PyTorch (out, in) layout, zero-padded rows
    w2_ref: (H2, H1)     bf16
    w3_ref: (1,  H2)     bf16
    b1/b2 : (H, 1) f32 column biases; b3: (1, 1) f32 scalar in SMEM
    o_ref : (1, TB) f32  lane-dense output tile
    """
    x = x_ref[...].astype(jnp.bfloat16)                      # (TB, n_in)

    # layer 1: contract n_in of (H1, n_in) with n_in of (TB, n_in) -> (H1, TB)
    h1 = lax.dot_general(
        w1_ref[...], x,
        dimension_numbers=(((1,), (1,)), ((), ())),
        preferred_element_type=jnp.float32)
    h1 = jnp.maximum(h1 + b1_ref[...], 0.0)                  # (H1, TB) f32

    # layer 2: (H2, H1) @ (H1, TB) -> (H2, TB)
    h2 = jnp.dot(w2_ref[...], h1.astype(jnp.bfloat16),
                 preferred_element_type=jnp.float32)
    h2 = jnp.maximum(h2 + b2_ref[...], 0.0)                  # (H2, TB) f32

    # head: (1, H2) @ (H2, TB) -> (1, TB)  (already lane-dense)
    out = jnp.dot(w3_ref[...], h2.astype(jnp.bfloat16),
                  preferred_element_type=jnp.float32)
    o_ref[...] = (out + b3_ref[0, 0]).astype(o_ref.dtype)


def pponn_forward(x, kparams, *, tile_b=1024):
    """Fused PPONN forward.

    x: (B, n_in) float array
    kparams: output of prepare_kernel_params (padded, bf16 weights / f32 biases)
    returns: (B, 1) float32
    """
    B, n_in = x.shape
    w1, b1 = kparams["w1"], kparams["b1"]
    w2, b2 = kparams["w2"], kparams["b2"]
    w3, b3 = kparams["w3"], kparams["b3"]
    H1 = w1.shape[0]
    H2 = w2.shape[0]
    assert w1.shape == (H1, n_in) and w2.shape == (H2, H1) and w3.shape == (1, H2)

    # Batch tile: ~1024 rows (within VMEM budget on v5e/v6e/v7x); small batches
    # become a single full-extent tile (rounded to a sublane multiple).
    if B <= tile_b:
        TB = _round_up(B, 8)
    else:
        TB = tile_b
    B_pad = _round_up(B, TB)
    x_p = jnp.pad(x, ((0, B_pad - B), (0, 0))) if B_pad != B else x

    grid = (B_pad // TB,)

    def resident(shape):
        # weights/biases: same block every grid step -> stays in VMEM, no re-DMA
        return pl.BlockSpec(shape, lambda i: (0,) * len(shape))

    bytes_x = B_pad * n_in * x_p.dtype.itemsize
    bytes_w = (n_in * H1 + H1 * H2 + H2) * 2 + (H1 + H2 + 1) * 4
    cost = pl.CostEstimate(
        flops=2 * B_pad * (n_in * H1 + H1 * H2 + H2),
        transcendentals=0,
        bytes_accessed=bytes_x + bytes_w + B_pad * 4,
    )

    out = pl.pallas_call(
        _pponn_kernel,
        out_shape=jax.ShapeDtypeStruct((1, B_pad), jnp.float32),
        grid=grid,
        in_specs=[
            pl.BlockSpec((TB, n_in), lambda i: (i, 0)),          # batch-tiled x
            resident((H1, n_in)),                                # w1
            resident((H1, 1)),                                   # b1
            resident((H2, H1)),                                  # w2
            resident((H2, 1)),                                   # b2
            resident((1, H2)),                                   # w3
            pl.BlockSpec(memory_space=pltpu.MemorySpace.SMEM),   # b3 scalar
        ],
        out_specs=pl.BlockSpec((1, TB), lambda i: (0, i)),       # lane-dense output
        compiler_params=pltpu.CompilerParams(
            dimension_semantics=("parallel",)),
        cost_estimate=cost,
    )(x_p, w1, b1, w2, b2, w3, b3)

    # (1, B_pad) -> (B, 1); row-major order is preserved by the reshape.
    return out.reshape(B_pad, 1)[:B]


def init_pponn_params(key, num_input, hid1=60, hid2=60, n_out=1):
    """PyTorch nn.Linear default init, U(-1/sqrt(fan_in), 1/sqrt(fan_in)).
    Weights kept in PyTorch (out, in) layout, float32."""
    ks = jax.random.split(key, 6)

    def lin(kw, kb, fan_in, fan_out):
        bound = 1.0 / math.sqrt(fan_in)
        w = jax.random.uniform(kw, (fan_out, fan_in), jnp.float32, -bound, bound)
        b = jax.random.uniform(kb, (fan_out,), jnp.float32, -bound, bound)
        return w, b

    w1, b1 = lin(ks[0], ks[1], num_input, hid1)
    w2, b2 = lin(ks[2], ks[3], hid1, hid2)
    w3, b3 = lin(ks[4], ks[5], hid2, n_out)
    return {"w1": w1, "b1": b1, "w2": w2, "b2": b2, "w3": w3, "b3": b3}


def prepare_kernel_params(p):
    """Pad hidden widths 60 -> 64 (sublane multiple) with zeros and cast weights
    to bf16 for the MXU; biases stay f32 (column layout for batch-as-lanes)."""
    H1, n_in = p["w1"].shape
    H2 = p["w2"].shape[0]
    Hp1, Hp2 = _round_up(H1, 8), _round_up(H2, 8)
    bf = jnp.bfloat16

    w1p = jnp.zeros((Hp1, n_in), bf).at[:H1, :].set(p["w1"].astype(bf))
    b1p = jnp.zeros((Hp1, 1), jnp.float32).at[:H1, 0].set(p["b1"])
    w2p = jnp.zeros((Hp2, Hp1), bf).at[:H2, :H1].set(p["w2"].astype(bf))
    b2p = jnp.zeros((Hp2, 1), jnp.float32).at[:H2, 0].set(p["b2"])
    w3p = jnp.zeros((1, Hp2), bf).at[:, :H2].set(p["w3"].astype(bf))
    b3p = p["b3"].reshape(1, 1).astype(jnp.float32)
    return {"w1": w1p, "b1": b1p, "w2": w2p, "b2": b2p, "w3": w3p, "b3": b3p}


def _reference_forward_f32(x, p):
    h1 = jnp.maximum(x @ p["w1"].T + p["b1"], 0.0)
    h2 = jnp.maximum(h1 @ p["w2"].T + p["b2"], 0.0)
    return h2 @ p["w3"].T + p["b3"]


def _reference_forward_bf16(x, p):
    bf, f32 = jnp.bfloat16, jnp.float32
    h1 = jnp.maximum(
        jnp.dot(x.astype(bf), p["w1"].T.astype(bf), preferred_element_type=f32)
        + p["b1"], 0.0)
    h2 = jnp.maximum(
        jnp.dot(h1.astype(bf), p["w2"].T.astype(bf), preferred_element_type=f32)
        + p["b2"], 0.0)
    return (jnp.dot(h2.astype(bf), p["w3"].T.astype(bf), preferred_element_type=f32)
            + p["b3"])


if __name__ == "__main__":
    key = jax.random.PRNGKey(0)
    k_param, k_x = jax.random.split(key)

    num_input = 32
    batch = 8

    params = init_pponn_params(k_param, num_input)
    kparams = prepare_kernel_params(params)
    x = jax.random.normal(k_x, (batch, num_input), dtype=jnp.float32)

    out = pponn_forward(x, kparams)
    out = jax.block_until_ready(out)
    assert out.shape == (batch, 1)

    # tight check vs a reference using the same bf16-operand / f32-accumulate math
    ref_bf16 = _reference_forward_bf16(x, params)
    assert jnp.allclose(out, ref_bf16, atol=2e-3, rtol=2e-3)
    # loose check vs the pure-f32 PyTorch-equivalent forward
    ref_f32 = _reference_forward_f32(x, params)
    assert jnp.allclose(out, ref_f32, atol=5e-2, rtol=5e-2)

    # TODO(synk): minimize_loss / MSELoss / Adam (training step) intentionally not
    # implemented as a Pallas kernel; only the forward pass is kernelized.
    print("KERNEL_OK")
</pallas_src>

<mosaic_0001>
module attributes {stable_mosaic.version = 11 : i64} {
  func.func @_pponn_kernel(%arg0: i32, %arg1: memref<8x32xf32, #tpu.memory_space<vmem>>, %arg2: memref<64x32xbf16, #tpu.memory_space<vmem>>, %arg3: memref<64x1xf32, #tpu.memory_space<vmem>>, %arg4: memref<64x64xbf16, #tpu.memory_space<vmem>>, %arg5: memref<64x1xf32, #tpu.memory_space<vmem>>, %arg6: memref<1x64xbf16, #tpu.memory_space<vmem>>, %arg7: memref<1x1xf32, #tpu.memory_space<smem>>, %arg8: memref<1x8xf32, #tpu.memory_space<vmem>>) attributes {dimension_semantics = [#tpu.dimension_semantics<parallel>], iteration_bounds = array<i64: 1>, scalar_prefetch = 0 : i64, scratch_operands = 0 : i64, tpu.core_type = #tpu.core_type<tc>, window_params = [{transform_indices = @transform_0, window_bounds = array<i64: 8, 32>}, {pipeline_mode = #tpu.pipeline_mode<synchronous>, transform_indices = @transform_1, window_bounds = array<i64: 64, 32>}, {pipeline_mode = #tpu.pipeline_mode<synchronous>, transform_indices = @transform_2, window_bounds = array<i64: 64, 1>}, {pipeline_mode = #tpu.pipeline_mode<synchronous>, transform_indices = @transform_3, window_bounds = array<i64: 64, 64>}, {pipeline_mode = #tpu.pipeline_mode<synchronous>, transform_indices = @transform_4, window_bounds = array<i64: 64, 1>}, {pipeline_mode = #tpu.pipeline_mode<synchronous>, transform_indices = @transform_5, window_bounds = array<i64: 1, 64>}, {transform_indices = @transform_6, window_bounds = array<i64: 1, 1>}, {transform_indices = @transform_7, window_bounds = array<i64: 1, 8>}]} {
    %c0 = arith.constant 0 : index
    %c0_0 = arith.constant 0 : index
    %0 = vector.load %arg1[%c0, %c0_0] : memref<8x32xf32, #tpu.memory_space<vmem>>, vector<8x32xf32>
    %1 = arith.truncf %0 : vector<8x32xf32> to vector<8x32xbf16>
    %c0_1 = arith.constant 0 : index
    %c0_2 = arith.constant 0 : index
    %2 = vector.load %arg2[%c0_1, %c0_2] : memref<64x32xbf16, #tpu.memory_space<vmem>>, vector<64x32xbf16>
    %cst = arith.constant dense<0.000000e+00> : vector<64x8xf32>
    %3 = tpu.matmul %2, %1, %cst {dimension_numbers = #tpu.dot_dimension_numbers<[1], [1], [0], [0], [0, 0, 1, 0], [], []>} : vector<64x32xbf16>, vector<8x32xbf16>, vector<64x8xf32> -> vector<64x8xf32>
    %c0_3 = arith.constant 0 : index
    %c0_4 = arith.constant 0 : index
    %4 = vector.load %arg3[%c0_3, %c0_4] : memref<64x1xf32, #tpu.memory_space<vmem>>, vector<64x1xf32>
    %5 = vector.broadcast %4 : vector<64x1xf32> to vector<64x8xf32>
    %6 = arith.addf %3, %5 : vector<64x8xf32>
    %cst_5 = arith.constant 0.000000e+00 : f32
    %7 = vector.broadcast %cst_5 : f32 to vector<64x8xf32>
    %8 = arith.maximumf %6, %7 : vector<64x8xf32>
    %c0_6 = arith.constant 0 : index
    %c0_7 = arith.constant 0 : index
    %9 = vector.load %arg4[%c0_6, %c0_7] : memref<64x64xbf16, #tpu.memory_space<vmem>>, vector<64x64xbf16>
    %10 = arith.truncf %8 : vector<64x8xf32> to vector<64x8xbf16>
    %cst_8 = arith.constant dense<0.000000e+00> : vector<64x8xf32>
    %11 = tpu.matmul %9, %10, %cst_8 {dimension_numbers = #tpu.dot_dimension_numbers<[1], [0], [0], [1], [0, 0, 1, 1], [], []>} : vector<64x64xbf16>, vector<64x8xbf16>, vector<64x8xf32> -> vector<64x8xf32>
    %c0_9 = arith.constant 0 : index
    %c0_10 = arith.constant 0 : index
    %12 = vector.load %arg5[%c0_9, %c0_10] : memref<64x1xf32, #tpu.memory_space<vmem>>, vector<64x1xf32>
    %13 = vector.broadcast %12 : vector<64x1xf32> to vector<64x8xf32>
    %14 = arith.addf %11, %13 : vector<64x8xf32>
    %cst_11 = arith.constant 0.000000e+00 : f32
    %15 = vector.broadcast %cst_11 : f32 to vector<64x8xf32>
    %16 = arith.maximumf %14, %15 : vector<64x8xf32>
    %c0_12 = arith.constant 0 : index
    %c0_13 = arith.constant 0 : index
    %17 = vector.load %arg6[%c0_12, %c0_13] : memref<1x64xbf16, #tpu.memory_space<vmem>>, vector<1x64xbf16>
    %18 = arith.truncf %16 : vector<64x8xf32> to vector<64x8xbf16>
    %cst_14 = arith.constant dense<0.000000e+00> : vector<1x8xf32>
    %19 = tpu.matmul %17, %18, %cst_14 {dimension_numbers = #tpu.dot_dimension_numbers<[1], [0], [0], [1], [0, 0, 1, 1], [], []>} : vector<1x64xbf16>, vector<64x8xbf16>, vector<1x8xf32> -> vector<1x8xf32>
    %c0_15 = arith.constant 0 : index
    %c0_16 = arith.constant 0 : index
    %20 = memref.load %arg7[%c0_15, %c0_16] : memref<1x1xf32, #tpu.memory_space<smem>>
    %21 = vector.broadcast %20 : f32 to vector<1x8xf32>
    %22 = arith.addf %19, %21 : vector<1x8xf32>
    %c0_17 = arith.constant 0 : index
    %c0_18 = arith.constant 0 : index
    %23 = vector.load %arg8[%c0_17, %c0_18] : memref<1x8xf32, #tpu.memory_space<vmem>>, vector<1x8xf32>
    tpu.vector_store %arg8[%c0_17, %c0_18], %22 {strides = array<i32>} : memref<1x8xf32, #tpu.memory_space<vmem>>, vector<1x8xf32>,
    return
  }
  func.func @transform_0(%arg0: i32) -> (i32, i32) {
    %c0_i32 = arith.constant 0 : i32
    %c0_i32_0 = arith.constant 0 : i32
    return %arg0, %c0_i32 : i32, i32
  }
  func.func @transform_1(%arg0: i32) -> (i32, i32) {
    %c0_i32 = arith.constant 0 : i32
    %c0_i32_0 = arith.constant 0 : i32
    %c0_i32_1 = arith.constant 0 : i32
    return %c0_i32, %c0_i32_0 : i32, i32
  }
  func.func @transform_2(%arg0: i32) -> (i32, i32) {
    %c0_i32 = arith.constant 0 : i32
    %c0_i32_0 = arith.constant 0 : i32
    %c0_i32_1 = arith.constant 0 : i32
    return %c0_i32, %c0_i32_0 : i32, i32
  }
  func.func @transform_3(%arg0: i32) -> (i32, i32) {
    %c0_i32 = arith.constant 0 : i32
    %c0_i32_0 = arith.constant 0 : i32
    %c0_i32_1 = arith.constant 0 : i32
    return %c0_i32, %c0_i32_0 : i32, i32
  }
  func.func @transform_4(%arg0: i32) -> (i32, i32) {
    %c0_i32 = arith.constant 0 : i32
    %c0_i32_0 = arith.constant 0 : i32
    %c0_i32_1 = arith.constant 0 : i32
    return %c0_i32, %c0_i32_0 : i32, i32
  }
  func.func @transform_5(%arg0: i32) -> (i32, i32) {
    %c0_i32 = arith.constant 0 : i32
    %c0_i32_0 = arith.constant 0 : i32
    %c0_i32_1 = arith.constant 0 : i32
    return %c0_i32, %c0_i32_0 : i32, i32
  }
  func.func @transform_6(%arg0: i32) -> (i32, i32) {
    %c0_i32 = arith.constant 0 : i32
    %c0_i32_0 = arith.constant 0 : i32
    %c0_i32_1 = arith.constant 0 : i32
    return %c0_i32, %c0_i32_0 : i32, i32
  }
  func.func @transform_7(%arg0: i32) -> (i32, i32) {
    %c0_i32 = arith.constant 0 : i32
    %c0_i32_0 = arith.constant 0 : i32
    return %c0_i32, %arg0 : i32, i32
  }
}

</mosaic_0001>

<bundles_post_ra>
// kernel: tpu_custom_call.1
= control target key start
LH: loop header
LB: loop body
LE: loop exit
PB: predicated region body
PF: predicated region fallthrough
CT: control target
= control target key end

     0   :  { %vm107_vm0 = vcmask 261120   ;;  %v540_v3 = vmov 0   ;;  %s688_s0 = inlined_call_operand.vmem [shape: f32[8,32], index: 0, kind: input, shape index: {}]   ;;  %s689_s1 = inlined_call_operand.vmem [shape: bf16[64,32], index: 1, kind: input, shape index: {}]   ;;  %s690_s2 = inlined_call_operand.vmem [shape: f32[64,1], index: 2, kind: input, shape index: {}]   ;;  %s691_s3 = inlined_call_operand.vmem [shape: bf16[64,64], index: 3, kind: input, shape index: {}]   ;;  %s692_s4 = inlined_call_operand.vmem [shape: f32[64,1], index: 4, kind: input, shape index: {}]   ;;  %s693_s5 = inlined_call_operand.vmem [shape: bf16[1,64], index: 5, kind: input, shape index: {}]   ;;  %s694_s6 = inlined_call_operand.<no memory space> [shape: f32[1,1], index: 6, kind: input, shape index: {}]   ;;  %s695_s7 = inlined_call_operand.hbm [shape: f32[1,8], index: 7, kind: output, shape index: {}]  }
   0x1   :  { %v29_v0 = vld [vmem:[%s688_s0] sm:$0xff]  ;;  %506 = vset.pattern.permute.xlu0 %v540_v3  ;;  %507 = vset.pattern.permute.xlu1 %v540_v3  ;;  %v41_v6 = vld [vmem:[%s690_s2 + $0x10] sm:$0xff]  ;;  %v40_v7 = vld [vmem:[%s690_s2 + $0x8] sm:$0xff] }
   0x2   :  { %v30_v1 = vpack.c.bf16 %v29_v0, %v29_v0  ;;  %v508_v2 = vld [vmem:[%s689_s1] sm:$0xff]   ;;  %59 = vperm.xlu1 %507, %v41_v6   ;;  %v42_v8 = vld [vmem:[%s690_s2 + $0x18] sm:$0xff]  ;;  %v509_v9 = vld [vmem:[%s689_s1 + $0x8] sm:$0xff]  }
   0x3   :  { %465 = vmatprep.mubr.msk.bf16.mxu0 %vm107_vm0, %v508_v2  ;;  %v39_v5 = vld [vmem:[%s690_s2] sm:$0xff]  ;;  %v510_v10 = vld [vmem:[%s689_s1 + $0x10] sm:$0xff]   ;;  %v44_v12 = vld [vmem:[%s690_s2 + $0x28] sm:$0xff] }
   0x4   :  { %501 = vmatprep.subr.msk.bf16.mxu0 %vm107_vm0, %v30_v1  ;;  %v121_v4 = vsel %vm107_vm0, %v30_v1, 0  ;;  %49 = vperm.xlu0 %506, %v39_v5   ;;  %v43_v11 = vld [vmem:[%s690_s2 + $0x20] sm:$0xff] }
   0x5   :  { %464 = vmatpush3.bf16.xpose.msra.mxu0 %v121_v4 }
   0x6   :  { %64 = vperm.xlu1 %507, %v42_v8  }
   0x8   :  { %54 = vperm.xlu0 %506, %v40_v7  }
   0xc   :  { %466 = vmatmul.mubr.msk.bf16.vlgmr.msra.gmra.mrb[0].mxu0 %vm107_vm0, %v509_v9 }
   0xd   :  { %469 = vmatprep.mubr.msk.bf16.mxu0 %vm107_vm0, %v510_v10 }
   0xe   :  { %13 = vsyncpa [#allocation4], 0  ;;  %69 = vperm.xlu0 %506, %v43_v11   ;;  %74 = vperm.xlu1 %507, %v44_v12   ;;  %v45_v13 = vld [vmem:[%s690_s2 + $0x30] sm:$0xff]  ;;  %v46_v14 = vld [vmem:[%s690_s2 + $0x38] sm:$0xff]  ;;  %vm276_vm1 = vcmask 523264   ;;  %v541_v0 = vmov 0.0  }
   0xf   :  { %v511_v15 = vld [vmem:[%s689_s1 + $0x18] sm:$0xff]   ;;  %v208_v16 = vld [vmem:[%s692_s4] sm:$0xff]  ;;  %v209_v17 = vld [vmem:[%s692_s4 + $0x8] sm:$0xff]  ;;  %489 = vmatprep.subr.bf16.mxu0 %v541_v0  ;;  %vm542_vm2 = vmmov 0   ;;  %s543_s26 = smov [#allocation3]   ;;  %vm412_vm3 = vcmask 57344  }
  0x10   :  { %v210_v18 = vld [vmem:[%s692_s4 + $0x10] sm:$0xff]  ;;  %v211_v19 = vld [vmem:[%s692_s4 + $0x18] sm:$0xff]  ;;  %v212_v20 = vld [vmem:[%s692_s4 + $0x20] sm:$0xff]  ;;  %s420_s27 = sshll.u32 %s543_s26, 4  ;;  %s421_s27 = int_to_ptr.vmem [resolvable:$true] %s420_s27 }
  0x11   :  { %v213_v21 = vld [vmem:[%s692_s4 + $0x28] sm:$0xff]  ;;  %v214_v22 = vld [vmem:[%s692_s4 + $0x30] sm:$0xff]  ;;  %v215_v23 = vld [vmem:[%s692_s4 + $0x38] sm:$0xff]  ;;  %s516_s28 = scalar_lea.vmem %s421_s27, 16  ;;  %s520_s29 = scalar_lea.vmem %s421_s27, 32 }
  0x12   :  { %79 = vperm.xlu0 %506, %v45_v13   ;;  %84 = vperm.xlu1 %507, %v46_v14   ;;  %v512_v24 = vld [vmem:[%s691_s3] sm:$0xff]   ;;  %v513_v61 = vld [vmem:[%s691_s3 + $0x8] sm:$0xff]   ;;  %v514_v62 = vld [vmem:[%s691_s3 + $0x10] sm:$0xff]   ;;  %p517_p0 = scmp.ne.s32.totalorder %s421_s27, %s516_s28  ;;  %p521_p1 = scmp.lt.s32.totalorder %s421_s27, %s421_s27 }
  0x13   :  { %481 = vmatprep.mubr.msk.bf16.mxu1 %vm276_vm1, %v512_v24  ;;  %v515_v63 = vld [vmem:[%s691_s3 + $0x18] sm:$0xff]   ;;  %p522_p2 = scmp.lt.s32.totalorder %s520_s29, %s516_s28 }
  0x14   :  { %470 = vmatmul.mubr.msk.bf16.gmra.mrb[4].mxu0 %vm107_vm0, %v511_v15 }
  0x15   :  { %497 = vmatprep.mubr.msk.bf16.mxu0 %vm542_vm2, %v541_v0  ;;  %p523_p3 = por %p522_p2, %p521_p1 }
  0x16   :  { %218 = vperm.xlu0 %506, %v208_v16   ;;  %223 = vperm.xlu1 %507, %v209_v17  }
  0x17   :  { %p524_p4 = pnand %p523_p3, %p517_p0 }
  0x1a   :  { %228 = vperm.xlu0 %506, %v210_v18   ;;  %233 = vperm.xlu1 %507, %v211_v19  }
  0x1e   :  { %238 = vperm.xlu0 %506, %v212_v20   ;;  %243 = vperm.xlu1 %507, %v213_v21  }
  0x22   :  { %248 = vperm.xlu0 %506, %v214_v22   ;;  %253 = vperm.xlu1 %507, %v215_v23  }
  0x81   :  { %v60_v26 = vpop.permute.xlu1 %59 }
  0x83   :  { %v50_v25 = vpop.permute.xlu0 %49 }
  0x85   :  { %v65_v28 = vpop.permute.xlu1 %64 }
  0x87   :  { %v55_v27 = vpop.permute.xlu0 %54 }
  0x8d   :  { %v70_v32 = vpop.permute.xlu0 %69  ;;  %v75_v37 = vpop.permute.xlu1 %74 }
  0x91   :  { %v80_v44 = vpop.permute.xlu0 %79  ;;  %v85_v49 = vpop.permute.xlu1 %84 }
  0x95   :  { %v219_v1 = vpop.permute.xlu0 %218  ;;  %v224_v2 = vpop.permute.xlu1 %223 }
  0x99   :  { %v229_v3 = vpop.permute.xlu0 %228  ;;  %v234_v4 = vpop.permute.xlu1 %233 }
  0x9d   :  { %v239_v8 = vpop.permute.xlu0 %238  ;;  %v244_v13 = vpop.permute.xlu1 %243 }
  0xa1   :  { %v249_v20 = vpop.permute.xlu0 %248 }
  0xdf   :  { %v467_v29 = vpop.f32.mrb[0].mxu0 }
  0xe0   :  { %v166_v30 = vadd.f32 %v467_v29, %v60_v26  ;;  %v157_v31 = vpop.f32.mrb[1].mxu0 }
  0xe1   :  { %v158_v33 = vadd.f32 %v157_v31, %v50_v25  ;;  %v468_v34 = vpop.f32.mrb[2].mxu0  ;;  %v254_v25 = vpop.permute.xlu1 %253 }
  0xe2   :  { %v169_v35 = vadd.f32 %v468_v34, %v65_v28  ;;  %v160_v36 = vpop.f32.mrb[3].mxu0  ;;  %v190_v39 = vmax.f32 %v166_v30, 0.0 }
  0xe3   :  { %v161_v38 = vadd.f32 %v160_v36, %v55_v27  ;;  %v188_v41 = vmax.f32 %v158_v33, 0.0 }
  0xe4   :  { %v191_v40 = vmax.f32 %v169_v35, 0.0 }
  0xe5   :  { %v189_v42 = vmax.f32 %v161_v38, 0.0  ;;  %v368_v38 = vstv %s694_s6 }
  0xe6   :  { %v205_v43 = vpack.c.bf16 %v191_v40, %v190_v39 }
  0xe7   :  { %v471_v45 = vpop.f32.mrb[4].mxu0  ;;  %v204_v46 = vpack.c.bf16 %v189_v42, %v188_v41 }
  0xe8   :  { %v182_v47 = vadd.f32 %v471_v45, %v80_v44  ;;  %v173_v48 = vpop.f32.mrb[5].mxu0 }
  0xe9   :  { %v174_v50 = vadd.f32 %v173_v48, %v70_v32  ;;  %v472_v51 = vpop.f32.mrb[6].mxu0  ;;  %473 = vmatprep.subr.bf16.mxu1 %v204_v46 }
  0xea   :  { %v185_v52 = vadd.f32 %v472_v51, %v85_v49  ;;  %v176_v53 = vpop.f32.mrb[7].mxu0  ;;  %474 = vmatpush3.bf16.msra.mxu1 %v204_v46  ;;  %v194_v55 = vmax.f32 %v182_v47, 0.0 }
  0xeb   :  { %v177_v54 = vadd.f32 %v176_v53, %v75_v37  ;;  %475 = vmatprep.subr.bf16.mxu1 %v205_v43  ;;  %v192_v57 = vmax.f32 %v174_v50, 0.0  ;;  %v362_v37 = vld [vmem:[%s693_s5] sm:$0x1] }
  0xec   :  { %v195_v56 = vmax.f32 %v185_v52, 0.0 }
  0xed   :  { %v193_v58 = vmax.f32 %v177_v54, 0.0 }
  0xee   :  { %v207_v59 = vpack.c.bf16 %v195_v56, %v194_v55  ;;  %476 = vmatpush3.bf16.msra.mxu1 %v205_v43 }
  0xef   :  { %v206_v60 = vpack.c.bf16 %v193_v58, %v192_v57 }
  0xf1   :  { %477 = vmatprep.subr.bf16.mxu1 %v206_v60 }
  0xf2   :  { %478 = vmatpush3.bf16.msra.mxu1 %v206_v60 }
  0xf3   :  { %479 = vmatprep.subr.bf16.mxu1 %v207_v59 }
  0xf6   :  { %480 = vmatpush3.bf16.msra.mxu1 %v207_v59 }
  0xf9   :  { %482 = vmatmul.mubr.msk.bf16.vlgmr.msra.gmra.mrb[0].mxu1 %vm276_vm1, %v513_v61 }
  0xfa   :  { %485 = vmatprep.mubr.msk.bf16.mxu1 %vm276_vm1, %v514_v62 }
 0x101   :  { %486 = vmatmul.mubr.msk.bf16.gmra.mrb[4].mxu1 %vm276_vm1, %v515_v63 }
 0x1cc   :  { %v483_v5 = vpop.f32.mrb[0].mxu1 }
 0x1cd   :  { %v332_v6 = vadd.f32 %v483_v5, %v229_v3  ;;  %v323_v7 = vpop.f32.mrb[1].mxu1 }
 0x1ce   :  { %v324_v9 = vadd.f32 %v323_v7, %v219_v1  ;;  %v484_v10 = vpop.f32.mrb[2].mxu1 }
 0x1cf   :  { %v335_v11 = vadd.f32 %v484_v10, %v234_v4  ;;  %v326_v12 = vpop.f32.mrb[3].mxu1  ;;  %v356_v15 = vmax.f32 %v332_v6, 0.0 }
 0x1d0   :  { %v327_v14 = vadd.f32 %v326_v12, %v224_v2  ;;  %v354_v17 = vmax.f32 %v324_v9, 0.0 }
 0x1d1   :  { %v357_v16 = vmax.f32 %v335_v11, 0.0 }
 0x1d2   :  { %v355_v18 = vmax.f32 %v327_v14, 0.0 }
 0x1d3   :  { %v364_v19 = vpack.c.bf16 %v357_v16, %v356_v15 }
 0x1d4   :  { %v363_v21 = vpack.c.bf16 %v355_v18, %v354_v17  ;;  %v487_v22 = vpop.f32.mrb[4].mxu1 }
 0x1d5   :  { %v348_v23 = vadd.f32 %v487_v22, %v249_v20  ;;  %v339_v24 = vpop.f32.mrb[5].mxu1 }
 0x1d6   :  { %v340_v26 = vadd.f32 %v339_v24, %v239_v8  ;;  %v488_v27 = vpop.f32.mrb[6].mxu1  ;;  %490 = vmatpush3.bf16.msra.mxu0 %v363_v21 }
 0x1d7   :  { %v351_v28 = vadd.f32 %v488_v27, %v254_v25  ;;  %v342_v29 = vpop.f32.mrb[7].mxu1  ;;  %491 = vmatprep.subr.bf16.mxu0 %v541_v0  ;;  %v360_v31 = vmax.f32 %v348_v23, 0.0 }
 0x1d8   :  { %v343_v30 = vadd.f32 %v342_v29, %v244_v13  ;;  %v358_v33 = vmax.f32 %v340_v26, 0.0 }
 0x1d9   :  { %v361_v32 = vmax.f32 %v351_v28, 0.0 }
 0x1da   :  { %v359_v34 = vmax.f32 %v343_v30, 0.0  ;;  %492 = vmatpush3.bf16.msra.mxu0 %v364_v19 }
 0x1db   :  { %v366_v35 = vpack.c.bf16 %v361_v32, %v360_v31  ;;  %493 = vmatprep.subr.bf16.mxu0 %v541_v0 }
 0x1dc   :  { %v365_v36 = vpack.c.bf16 %v359_v34, %v358_v33 }
 0x1de   :  { %494 = vmatpush3.bf16.msra.mxu0 %v365_v36 }
 0x1df   :  { %495 = vmatprep.subr.bf16.mxu0 %v541_v0 }
 0x1e2   :  { %496 = vmatpush3.bf16.msra.mxu0 %v366_v35 }
 0x1e5   :  { %498 = vmatmul.mubr.msk.bf16.vlgmr.msra.gmra.mrb[8].mxu0 %vm276_vm1, %v362_v37 }
 0x2b8   :  { %v406_v39 = vpop.f32.mrb[8].mxu0 }
 0x2b9   :  { %v407_v40 = vadd.f32 %v406_v39, %v368_v38  ;;  %v499_v41 = vpop.f32.mrb[9].mxu0 }
 0x2ba   :  { %v409_v42 = vpop.f32.mrb[10].mxu0 }
 0x2bb   :  { %v500_v43 = vpop.f32.mrb[11].mxu0  ;;  %413 = vst.msk [vmem:[#allocation3] sm:$0x1] %vm412_vm3, %v407_v40 }
 0x2bc   :  { %527 = shalt.err (!%p524_p4)
}
 0x2bd   :  { %s528_s0 = scalar_lea.hbm %s695_s7, 16 }
 0x2be   :  { %p529_p5 = scmp.ne.s32.totalorder %s695_s7, %s528_s0  ;;  %p532_p6 = scmp.lt.u32.totalorder %s528_s0, %s695_s7 }
 0x2c0   :  { %p534_p7 = pnand %p532_p6, %p529_p5 }
 0x2c2   :  { %537 = shalt.err (!%p534_p7)
}
 0x2c3   :  { %423 = dma.vmem_to_hbm [thread:$0]  %s421_s27, 16, %s695_s7, [#allocation4]  }
 0x2c4   :  { %538 = dma.done.wait [#allocation4], 16  }
 0x2c5   :  { %539 = vsyncadd [#allocation4], 4294967280 }
 0x2c6   :  { %427 = vsyncpa [#allocation4], 1 }

</bundles_post_ra>
